<compile_context>
chip_gen: v5e
topology: v5e:2x2
jax: 0.10.0
libtpu: 0.0.40
codegen_flags: <defaults>
</compile_context>

<pallas_src>
import jax
import jax.numpy as jnp
from jax.experimental import pallas as pl
from jax.experimental.pallas import tpu as pltpu


def skconv_kernel(w_ref, b_ref, p_ref, out_ref):
    """Fused im2col conv (+folded BN scale) + bias + ReLU, transposed layout.

    w_ref : (C, 9*C)   BN-scale-folded dense conv weight (row = out channel)
    b_ref : (C, 1)     folded BN bias (column vector, lane-broadcast)
    p_ref : (9*C, TN)  im2col patches, transposed (pixel index on lanes)
    out   : (C, TN)    lane-dense output tile
    """
    acc = jnp.dot(w_ref[...], p_ref[...], preferred_element_type=jnp.float32)
    out_ref[...] = jnp.maximum(acc + b_ref[...], 0.0)


def skconv_forward(x_nchw, params, G, M=1):
    """NCHW in/out wrapper: weight folding, transposed im2col, pallas_call."""
    assert M == 1, "module only instantiates a single conv branch (M == 1)"
    # TODO(synk): generalize to M > 1 (needs the GAP/fc/fcs/softmax branch in
    # the kernel); the reference PyTorch module cannot run with M > 1 anyway.
    B, C, H, W = x_nchw.shape
    N = B * H * W

    # ---- weight prep (one-time, plain XLA) ----
    # grouped conv weight (C, C//G, 3, 3) OIHW -> dense per-tap (C_in, C_out)
    Cg = C // G
    wt = params['conv_w'].reshape(G, Cg, Cg, 3, 3)              # (g, co, ci, kh, kw)
    wt = jnp.transpose(wt, (3, 4, 0, 2, 1))                     # (kh, kw, g, ci, co)
    eye_g = jnp.eye(G, dtype=wt.dtype)
    dense = jnp.einsum('xygio,gq->xygiqo', wt, eye_g)           # (kh,kw,g,ci,q,co)
    dense = dense.reshape(9, C, C)                              # (tap, ci_glob, co_glob)

    # fold BatchNorm (inference running stats): scale -> weight, keep bias
    eps = 1e-5
    bn_scale = params['bn_gamma'] / jnp.sqrt(params['bn_var'] + eps)
    bn_bias = params['bn_beta'] - params['bn_mean'] * bn_scale
    dense = dense * bn_scale[None, None, :]
    w_t = jnp.transpose(dense, (2, 0, 1)).reshape(C, 9 * C)     # (co, tap*C + ci)
    b_col = bn_bias.reshape(C, 1)

    # ---- transposed im2col patches (wrapper-side) ----
    xpad = jnp.pad(x_nchw, ((0, 0), (0, 0), (1, 1), (1, 1)))
    taps = [xpad[:, :, kh:kh + H, kw:kw + W]                    # each (B, C, H, W)
            for kh in range(3) for kw in range(3)]
    p_t = jnp.concatenate(
        [jnp.transpose(t, (1, 0, 2, 3)).reshape(C, N) for t in taps],
        axis=0)                                                 # (9C, N), k = tap*C + ci

    # ---- tile the pixel axis (lanes) ----
    if N % 128 == 0:
        TN = 128
        for cand in (512, 256):
            if N % cand == 0:
                TN = cand
                break
    else:
        TN = N                                                  # full-extent block

    out_t = pl.pallas_call(
        skconv_kernel,
        out_shape=jax.ShapeDtypeStruct((C, N), jnp.float32),
        grid_spec=pltpu.PrefetchScalarGridSpec(
            num_scalar_prefetch=0,
            grid=(N // TN,),
            in_specs=[
                pl.BlockSpec((C, 9 * C), lambda j: (0, 0)),
                pl.BlockSpec((C, 1), lambda j: (0, 0)),
                pl.BlockSpec((9 * C, TN), lambda j: (0, j)),
            ],
            out_specs=pl.BlockSpec((C, TN), lambda j: (0, j)),
        ),
        compiler_params=pltpu.CompilerParams(
            dimension_semantics=("parallel",)),
    )(w_t, b_col, p_t)

    # M == 1: softmax over the single branch axis is exactly 1, so V == feat.
    feat = out_t.reshape(C, B, H, W)
    return jnp.transpose(feat, (1, 0, 2, 3))                    # back to NCHW


def skconv_reference(x_nchw, params, G):
    """Pure-JAX reference matching the PyTorch forward (eval-mode BN, M=1),
    including the full GAP/fc/fcs/softmax attention path."""
    y = jax.lax.conv_general_dilated(
        x_nchw, params['conv_w'], window_strides=(1, 1),
        padding=((1, 1), (1, 1)),
        dimension_numbers=('NCHW', 'OIHW', 'NCHW'),
        feature_group_count=G)
    eps = 1e-5
    scale = params['bn_gamma'] / jnp.sqrt(params['bn_var'] + eps)
    bias = params['bn_beta'] - params['bn_mean'] * scale
    feat = jnp.maximum(y * scale[None, :, None, None] + bias[None, :, None, None], 0.0)
    U = feat                                                    # sum over M=1
    s = U.mean(axis=(2, 3))                                     # (B, C)
    z = s @ params['fc_w'].T + params['fc_b']                   # (B, d)
    att = z @ params['fcs_w'].T + params['fcs_b']               # (B, C)
    att = jax.nn.softmax(att[:, None, :], axis=1)               # (B, 1, C) -> ones
    V = (feat[:, None] * att[:, :, :, None, None]).sum(axis=1)
    return V


if __name__ == "__main__":
    # Module config (SKConv(features=32, M=1, G=4, r=8, L=16)): d = max(32//8, 16) = 16
    B, C, H, W = 2, 32, 8, 8
    G, r, L, M = 4, 8, 16, 1
    d = max(C // r, L)
    Cg = C // G

    key = jax.random.PRNGKey(0)
    ks = jax.random.split(key, 10)
    params = {
        'conv_w': jax.random.normal(ks[0], (C, Cg, 3, 3), jnp.float32) * 0.1,
        'bn_gamma': jax.random.uniform(ks[1], (C,), jnp.float32, 0.5, 1.5),
        'bn_beta': jax.random.normal(ks[2], (C,), jnp.float32) * 0.1,
        'bn_mean': jax.random.normal(ks[3], (C,), jnp.float32) * 0.1,
        'bn_var': jax.random.uniform(ks[4], (C,), jnp.float32, 0.5, 1.5),
        'fc_w': jax.random.normal(ks[5], (d, C), jnp.float32) * 0.1,
        'fc_b': jax.random.normal(ks[6], (d,), jnp.float32) * 0.1,
        'fcs_w': jax.random.normal(ks[7], (C, d), jnp.float32) * 0.1,
        'fcs_b': jax.random.normal(ks[8], (C,), jnp.float32) * 0.1,
    }
    x = jax.random.normal(ks[9], (B, C, H, W), jnp.float32)

    out = jax.block_until_ready(skconv_forward(x, params, G, M))
    ref = jax.block_until_ready(skconv_reference(x, params, G))

    assert out.shape == (B, C, H, W)
    assert jnp.allclose(out, ref, rtol=1e-4, atol=1e-4), (
        f"max abs err {jnp.max(jnp.abs(out - ref))}")
    print("KERNEL_OK")
</pallas_src>

<mosaic_0001>
module attributes {stable_mosaic.version = 11 : i64} {
  func.func @skconv_kernel(%arg0: i32, %arg1: memref<32x288xf32, #tpu.memory_space<vmem>>, %arg2: memref<32x1xf32, #tpu.memory_space<vmem>>, %arg3: memref<288x128xf32, #tpu.memory_space<vmem>>, %arg4: memref<32x128xf32, #tpu.memory_space<vmem>>) attributes {dimension_semantics = [#tpu.dimension_semantics<parallel>], iteration_bounds = array<i64: 1>, scalar_prefetch = 0 : i64, scratch_operands = 0 : i64, tpu.core_type = #tpu.core_type<tc>, window_params = [{pipeline_mode = #tpu.pipeline_mode<synchronous>, transform_indices = @transform_0, window_bounds = array<i64: 32, 288>}, {pipeline_mode = #tpu.pipeline_mode<synchronous>, transform_indices = @transform_1, window_bounds = array<i64: 32, 1>}, {transform_indices = @transform_2, window_bounds = array<i64: 288, 128>}, {transform_indices = @transform_3, window_bounds = array<i64: 32, 128>}]} {
    %c0 = arith.constant 0 : index
    %c0_0 = arith.constant 0 : index
    %0 = vector.load %arg1[%c0, %c0_0] : memref<32x288xf32, #tpu.memory_space<vmem>>, vector<32x288xf32>
    %c0_1 = arith.constant 0 : index
    %c0_2 = arith.constant 0 : index
    %1 = vector.load %arg3[%c0_1, %c0_2] : memref<288x128xf32, #tpu.memory_space<vmem>>, vector<288x128xf32>
    %cst = arith.constant dense<0.000000e+00> : vector<32x128xf32>
    %2 = tpu.matmul %0, %1, %cst {dimension_numbers = #tpu.dot_dimension_numbers<[1], [0], [0], [1], [0, 0, 1, 1], [], []>} : vector<32x288xf32>, vector<288x128xf32>, vector<32x128xf32> -> vector<32x128xf32>
    %c0_3 = arith.constant 0 : index
    %c0_4 = arith.constant 0 : index
    %3 = vector.load %arg2[%c0_3, %c0_4] : memref<32x1xf32, #tpu.memory_space<vmem>>, vector<32x1xf32>
    %4 = vector.broadcast %3 : vector<32x1xf32> to vector<32x128xf32>
    %5 = arith.addf %2, %4 : vector<32x128xf32>
    %cst_5 = arith.constant 0.000000e+00 : f32
    %6 = vector.broadcast %cst_5 : f32 to vector<32x128xf32>
    %7 = arith.maximumf %5, %6 : vector<32x128xf32>
    %c0_6 = arith.constant 0 : index
    %c0_7 = arith.constant 0 : index
    %8 = vector.load %arg4[%c0_6, %c0_7] : memref<32x128xf32, #tpu.memory_space<vmem>>, vector<32x128xf32>
    tpu.vector_store %arg4[%c0_6, %c0_7], %7 {strides = array<i32>} : memref<32x128xf32, #tpu.memory_space<vmem>>, vector<32x128xf32>,
    return
  }
  func.func @transform_0(%arg0: i32) -> (i32, i32) {
    %c0_i32 = arith.constant 0 : i32
    %c0_i32_0 = arith.constant 0 : i32
    %c0_i32_1 = arith.constant 0 : i32
    return %c0_i32, %c0_i32_0 : i32, i32
  }
  func.func @transform_1(%arg0: i32) -> (i32, i32) {
    %c0_i32 = arith.constant 0 : i32
    %c0_i32_0 = arith.constant 0 : i32
    %c0_i32_1 = arith.constant 0 : i32
    return %c0_i32, %c0_i32_0 : i32, i32
  }
  func.func @transform_2(%arg0: i32) -> (i32, i32) {
    %c0_i32 = arith.constant 0 : i32
    %c0_i32_0 = arith.constant 0 : i32
    return %c0_i32, %arg0 : i32, i32
  }
  func.func @transform_3(%arg0: i32) -> (i32, i32) {
    %c0_i32 = arith.constant 0 : i32
    %c0_i32_0 = arith.constant 0 : i32
    return %c0_i32, %arg0 : i32, i32
  }
}

</mosaic_0001>

<bundles_post_ra>
// kernel: tpu_custom_call.1
= control target key start
LH: loop header
LB: loop body
LE: loop exit
PB: predicated region body
PF: predicated region fallthrough
CT: control target
= control target key end

     0   :  { %8 = vsyncpa [#allocation3], 0  ;;  %s414_s0 = inlined_call_operand.hbm [shape: f32[32,288], index: 0, kind: input, shape index: {}]   ;;  %s415_s1 = inlined_call_operand.vmem [shape: f32[32,1], index: 1, kind: input, shape index: {}]   ;;  %s416_s2 = inlined_call_operand.hbm [shape: f32[288,128], index: 2, kind: input, shape index: {}]   ;;  %s417_s3 = inlined_call_operand.hbm [shape: f32[32,128], index: 3, kind: output, shape index: {}]  }
   0x1   :  { %9 = vsyncpa [#allocation6], 0 }
   0x2   :  { %10 = vsyncpa [#allocation4], 0  ;;  %s15_s14 = sshll.u32 %s414_s0, 4  ;;  %s355_s15 = smov [#allocation2]   ;;  %s16_s14 = int_to_ptr.hbm [resolvable:$true] %s15_s14 }
   0x3   :  { %s17_s16 = sshll.u32 %s355_s15, 4  ;;  %s30_s19 = sshll.u32 %s416_s2, 4  ;;  %s18_s16 = int_to_ptr.vmem [resolvable:$true] %s17_s16  ;;  %s31_s19 = int_to_ptr.hbm [resolvable:$true] %s30_s19 }
   0x4   :  { %s356_s20 = smov 384   ;;  %s357_s21 = smov 24  }
   0x5   :  { %23 = dma.hbm_to_vmem [thread:$0]  %s16_s14, 1536, %s18_s16, [#allocation3], %s356_s20, %s356_s20, %s357_s21  }
   0x6   :  { %s358_s22 = smov [#allocation5]   ;;  %s359_s24 = smov 128  }
   0x7   :  { %s32_s23 = sshll.u32 %s358_s22, 4  ;;  %s360_s25 = smov 8   ;;  %s33_s23 = int_to_ptr.vmem [resolvable:$true] %s32_s23 }
   0x8   :  { %38 = dma.hbm_to_vmem [thread:$0]  %s31_s19, 4608, %s33_s23, [#allocation6], %s359_s24, %s359_s24, %s360_s25  }
   0x9   :  { %349 = dma.done.wait [#allocation3], 1536  }
   0xa   :  { %350 = vsyncadd [#allocation3], 4294965760 }
   0xb   :  { %351 = dma.done.wait [#allocation6], 4608  }
   0xc   :  { %352 = vsyncadd [#allocation6], 4294962688  ;;  %v74_v0 = vld [vmem:[#allocation5 + $0x78] sm:$0xff]  ;;  %v73_v2 = vld [vmem:[#allocation5 + $0x70] sm:$0xff]  ;;  %v361_v5 = vmov 0   ;;  %vm119_vm0 = vcmask 261120  }
   0xd   :  { %v90_v1 = vld [vmem:[#allocation5 + $0xf8] sm:$0xff]  ;;  %132 = vmatpush.msra.mxu0 %v74_v0  ;;  %251 = vmatpush.msra.mxu3 %v74_v0  ;;  %v89_v3 = vld [vmem:[#allocation5 + $0xf0] sm:$0xff]  ;;  %v72_v4 = vld [vmem:[#allocation5 + $0x68] sm:$0xff]  ;;  %s233_s8 = sshll.u32 %s417_s3, 4  ;;  %s234_s8 = int_to_ptr.hbm [resolvable:$true] %s233_s8 }
   0xe   :  { %161 = vmatpush.msra.mxu1 %v90_v1  ;;  %275 = vset.pattern.permute.xlu0 %v361_v5  ;;  %v88_v6 = vld [vmem:[#allocation5 + $0xe8] sm:$0xff]  ;;  %v71_v7 = vld [vmem:[#allocation5 + $0x60] sm:$0xff]  ;;  %v70_v9 = vld [vmem:[#allocation5 + $0x58] sm:$0xff] }
   0xf   :  { %133 = vmatpush.msra.mxu0 %v73_v2  ;;  %252 = vmatpush.msra.mxu3 %v73_v2  ;;  %v87_v8 = vld [vmem:[#allocation5 + $0xe0] sm:$0xff]  ;;  %v86_v10 = vld [vmem:[#allocation5 + $0xd8] sm:$0xff]  ;;  %v69_v12 = vld [vmem:[#allocation5 + $0x50] sm:$0xff] }
  0x10   :  { %162 = vmatpush.msra.mxu1 %v89_v3  ;;  %276 = vset.pattern.permute.xlu1 %v361_v5  ;;  %v94_v11 = vld [vmem:[#allocation5 + $0x118] sm:$0xff]  ;;  %v93_v13 = vld [vmem:[#allocation5 + $0x110] sm:$0xff]  ;;  %v92_v15 = vld [vmem:[#allocation5 + $0x108] sm:$0xff] }
  0x11   :  { %134 = vmatpush.msra.mxu0 %v72_v4  ;;  %253 = vmatpush.msra.mxu3 %v72_v4  ;;  %v85_v14 = vld [vmem:[#allocation5 + $0xd0] sm:$0xff]  ;;  %v68_v16 = vld [vmem:[#allocation5 + $0x48] sm:$0xff]  ;;  %v91_v18 = vld [vmem:[#allocation5 + $0x100] sm:$0xff] }
  0x12   :  { %163 = vmatpush.msra.mxu1 %v88_v6  ;;  %202 = vmatpush.msra.mxu2 %v94_v11  ;;  %v84_v17 = vld [vmem:[#allocation5 + $0xc8] sm:$0xff]  ;;  %v67_v19 = vld [vmem:[#allocation5 + $0x40] sm:$0xff]  ;;  %v49_v21 = vld [vmem:[#allocation2 + $0x10] sm:$0xff] }
  0x13   :  { %135 = vmatpush.msra.mxu0 %v71_v7  ;;  %254 = vmatpush.msra.mxu3 %v71_v7  ;;  %v83_v20 = vld [vmem:[#allocation5 + $0xc0] sm:$0xff]  ;;  %v66_v22 = vld [vmem:[#allocation5 + $0x38] sm:$0xff]  ;;  %v65_v25 = vld [vmem:[#allocation5 + $0x30] sm:$0xff] }
  0x14   :  { %164 = vmatpush.msra.mxu1 %v87_v8  ;;  %203 = vmatpush.msra.mxu2 %v93_v13  ;;  %v82_v23 = vld [vmem:[#allocation5 + $0xb8] sm:$0xff]  ;;  %v95_v24 = vld [vmem:[%s415_s1] sm:$0xff]  ;;  %v81_v26 = vld [vmem:[#allocation5 + $0xb0] sm:$0xff] }
  0x15   :  { %136 = vmatpush.msra.mxu0 %v70_v9  ;;  %255 = vmatpush.msra.mxu3 %v70_v9  ;;  %v97_v27 = vld [vmem:[%s415_s1 + $0x10] sm:$0xff]  ;;  %v64_v28 = vld [vmem:[#allocation5 + $0x28] sm:$0xff]  ;;  %v63_v30 = vld [vmem:[#allocation5 + $0x20] sm:$0xff] }
  0x16   :  { %165 = vmatpush.msra.mxu1 %v86_v10  ;;  %204 = vmatpush.msra.mxu2 %v92_v15  ;;  %v80_v29 = vld [vmem:[#allocation5 + $0xa8] sm:$0xff]  ;;  %v79_v31 = vld [vmem:[#allocation5 + $0xa0] sm:$0xff]  ;;  %v62_v33 = vld [vmem:[#allocation5 + $0x18] sm:$0xff] }
  0x17   :  { %137 = vmatpush.msra.mxu0 %v69_v12  ;;  %256 = vmatpush.msra.mxu3 %v69_v12  ;;  %v52_v32 = vld [vmem:[#allocation2 + $0x28] sm:$0xff]  ;;  %v78_v34 = vld [vmem:[#allocation5 + $0x98] sm:$0xff]  ;;  %v61_v36 = vld [vmem:[#allocation5 + $0x10] sm:$0xff] }
  0x18   :  { %166 = vmatpush.msra.mxu1 %v85_v14  ;;  %205 = vmatpush.msra.mxu2 %v91_v18  ;;  %v96_v35 = vld [vmem:[%s415_s1 + $0x8] sm:$0xff]  ;;  %v77_v37 = vld [vmem:[#allocation5 + $0x90] sm:$0xff]  ;;  %v98_v38 = vld [vmem:[%s415_s1 + $0x18] sm:$0xff]  ;;  %s362_s1 = smov [#allocation7]  }
  0x19   :  { %138 = vmatpush.msra.mxu0 %v68_v16  ;;  %257 = vmatpush.msra.mxu3 %v68_v16  ;;  %v60_v39 = vld [vmem:[#allocation5 + $0x8] sm:$0xff]  ;;  %v59_v41 = vld [vmem:[#allocation5] sm:$0xff]  ;;  %v50_v44 = vld [vmem:[#allocation2 + $0x18] sm:$0xff]  ;;  %s231_s5 = sshll.u32 %s362_s1, 4  ;;  %s232_s5 = int_to_ptr.vmem [resolvable:$true] %s231_s5 }
  0x1a   :  { %167 = vmatpush.msra.mxu1 %v84_v17  ;;  %247 = vmatmul.msk.f32.vlgmr.msra.gmra.mxu2 %vm119_vm0, %v49_v21  ;;  %v76_v40 = vld [vmem:[#allocation5 + $0x88] sm:$0xff]  ;;  %v75_v42 = vld [vmem:[#allocation5 + $0x80] sm:$0xff]  ;;  %v53_v47 = vld [vmem:[#allocation2 + $0x30] sm:$0xff] }
  0x1b   :  { %139 = vmatpush.msra.mxu0 %v67_v19  ;;  %258 = vmatpush.msra.mxu3 %v67_v19  ;;  %v47_v43 = vld [vmem:[#allocation2] sm:$0xff]  ;;  %v48_v45 = vld [vmem:[#allocation2 + $0x8] sm:$0xff]  ;;  %v58_v49 = vld [vmem:[#allocation2 + $0x58] sm:$0xff] }
  0x1c   :  { %168 = vmatpush.msra.mxu1 %v83_v20  ;;  %101 = vperm.xlu0 %275, %v95_v24   ;;  %v55_v46 = vld [vmem:[#allocation2 + $0x40] sm:$0xff]  ;;  %v56_v50 = vld [vmem:[#allocation2 + $0x48] sm:$0xff]  ;;  %v54_v51 = vld [vmem:[#allocation2 + $0x38] sm:$0xff] }
  0x1d   :  { %140 = vmatpush.msra.mxu0 %v66_v22  ;;  %259 = vmatpush.msra.mxu3 %v66_v22  ;;  %v51_v48 = vld [vmem:[#allocation2 + $0x20] sm:$0xff]  ;;  %v57_v52 = vld [vmem:[#allocation2 + $0x50] sm:$0xff] }
  0x1e   :  { %169 = vmatpush.msra.mxu1 %v82_v23  ;;  %111 = vperm.xlu1 %276, %v97_v27  }
  0x1f   :  { %141 = vmatpush.msra.mxu0 %v65_v25  ;;  %260 = vmatpush.msra.mxu3 %v65_v25 }
  0x20   :  { %170 = vmatpush.msra.mxu1 %v81_v26 }
  0x21   :  { %142 = vmatpush.msra.mxu0 %v64_v28  ;;  %261 = vmatpush.msra.mxu3 %v64_v28 }
  0x22   :  { %171 = vmatpush.msra.mxu1 %v80_v29  ;;  %248 = vmatmul.msk.f32.gmra.mxu2 %vm119_vm0, %v52_v32 }
  0x23   :  { %143 = vmatpush.msra.mxu0 %v63_v30  ;;  %262 = vmatpush.msra.mxu3 %v63_v30 }
  0x24   :  { %172 = vmatpush.msra.mxu1 %v79_v31  ;;  %106 = vperm.xlu0 %275, %v96_v35  }
  0x25   :  { %144 = vmatpush.msra.mxu0 %v62_v33  ;;  %263 = vmatpush.msra.mxu3 %v62_v33 }
  0x26   :  { %173 = vmatpush.msra.mxu1 %v78_v34  ;;  %116 = vperm.xlu1 %276, %v98_v38  }
  0x27   :  { %145 = vmatpush.msra.mxu0 %v61_v36  ;;  %264 = vmatpush.msra.mxu3 %v61_v36 }
  0x28   :  { %174 = vmatpush.msra.mxu1 %v77_v37 }
  0x29   :  { %146 = vmatpush.msra.mxu0 %v60_v39  ;;  %265 = vmatpush.msra.mxu3 %v60_v39 }
  0x2a   :  { %175 = vmatpush.msra.mxu1 %v76_v40  ;;  %249 = vmatmul.msk.f32.gmra.mxu2 %vm119_vm0, %v55_v46 }
  0x2b   :  { %147 = vmatpush.msra.mxu0 %v59_v41  ;;  %266 = vmatpush.msra.mxu3 %v59_v41 }
  0x2c   :  { %176 = vmatpush.msra.mxu1 %v75_v42  ;;  %148 = vmatmul.f32.vlgmr.msra.gmra.mxu0 %v47_v43 }
  0x2d   :  { %151 = vmatmul.f32.vlgmr.msra.gmra.mxu3 %v50_v44  ;;  %177 = vmatmul.f32.vlgmr.msra.gmra.mxu1 %v48_v45 }
  0x32   :  { %250 = vmatmul.msk.f32.gmra.mxu2 %vm119_vm0, %v58_v49 }
  0x35   :  { %154 = vmatmul.f32.gmra.mxu3 %v53_v47  ;;  %180 = vmatmul.f32.gmra.mxu1 %v51_v48 }
  0x3d   :  { %157 = vmatmul.f32.gmra.mxu3 %v56_v50  ;;  %183 = vmatmul.f32.gmra.mxu1 %v54_v51 }
  0x45   :  { %186 = vmatmul.f32.gmra.mxu1 %v57_v52 }
  0x8e   :  { %v102_v53 = vpop.permute.xlu0 %101 }
  0x90   :  { %v112_v4 = vpop.permute.xlu1 %111 }
  0x96   :  { %v107_v60 = vpop.permute.xlu0 %106 }
  0x98   :  { %v117_v13 = vpop.permute.xlu1 %116 }
  0x9d   :  { %v207_v54 = vpop.f32.mrf.mxu2 }
  0xa5   :  { %v210_v61 = vpop.f32.mrf.mxu2 }
  0xa9   :  { %v149_v55 = vpop.f32.mrf.mxu0 }
  0xaa   :  { %v150_v56 = vadd.f32 %v149_v55, %v102_v53  ;;  %v178_v57 = vpop.f32.mrf.mxu1 }
  0xac   :  { %v179_v58 = vadd.f32 %v178_v57, %v150_v56 }
  0xad   :  { %v213_v7 = vpop.f32.mrf.mxu2 }
  0xae   :  { %v208_v59 = vadd.f32 %v207_v54, %v179_v58 }
  0xb0   :  { %v219_v62 = vmax.f32 %v208_v59, 0.0  ;;  %v152_v63 = vpop.f32.mrf.mxu3 }
  0xb1   :  { %v153_v0 = vadd.f32 %v152_v63, %v107_v60 }
  0xb2   :  { %223 = vst [vmem:[#allocation7] sm:$0xff] %v219_v62  ;;  %v181_v1 = vpop.f32.mrf.mxu1 }
  0xb3   :  { %v182_v2 = vadd.f32 %v181_v1, %v153_v0 }
  0xb5   :  { %v211_v3 = vadd.f32 %v210_v61, %v182_v2  ;;  %v216_v17 = vpop.f32.mrf.mxu2 }
  0xb7   :  { %v220_v5 = vmax.f32 %v211_v3, 0.0 }
  0xb8   :  { %v155_v6 = vpop.f32.mrf.mxu3 }
  0xb9   :  { %224 = vst [vmem:[#allocation7 + $0x8] sm:$0xff] %v220_v5  ;;  %v156_v8 = vadd.f32 %v155_v6, %v112_v4 }
  0xba   :  { %v184_v9 = vpop.f32.mrf.mxu1 }
  0xbb   :  { %v185_v10 = vadd.f32 %v184_v9, %v156_v8 }
  0xbd   :  { %v214_v11 = vadd.f32 %v213_v7, %v185_v10 }
  0xbf   :  { %v221_v12 = vmax.f32 %v214_v11, 0.0 }
  0xc0   :  { %v158_v14 = vpop.f32.mrf.mxu3 }
  0xc1   :  { %225 = vst [vmem:[#allocation7 + $0x10] sm:$0xff] %v221_v12  ;;  %v159_v15 = vadd.f32 %v158_v14, %v117_v13 }
  0xc2   :  { %v187_v16 = vpop.f32.mrf.mxu1 }
  0xc3   :  { %v188_v18 = vadd.f32 %v187_v16, %v159_v15 }
  0xc5   :  { %v217_v19 = vadd.f32 %v216_v17, %v188_v18 }
  0xc7   :  { %v222_v20 = vmax.f32 %v217_v19, 0.0 }
  0xc9   :  { %226 = vst [vmem:[#allocation7 + $0x18] sm:$0xff] %v222_v20 }
  0xca   :  { %239 = dma.vmem_to_hbm [thread:$0]  %s232_s5, 512, %s234_s8, [#allocation4], %s359_s24, %s359_s24, %s360_s25  }
  0xcb   :  { %353 = dma.done.wait [#allocation4], 512  }
  0xcc   :  { %354 = vsyncadd [#allocation4], 4294966784 }
  0xcd   :  { %244 = vsyncpa [#allocation3], 1 }
  0xce   :  { %245 = vsyncpa [#allocation6], 1 }
  0xcf   :  { %246 = vsyncpa [#allocation4], 1 }

</bundles_post_ra>
